<compile_context>
chip_gen: v5e
topology: v5e:2x2
jax: 0.10.0
libtpu: 0.0.40
codegen_flags: <defaults>
</compile_context>

<pallas_src>
import math

import jax
import jax.numpy as jnp
from jax.experimental import pallas as pl
from jax.experimental.pallas import tpu as pltpu

LANE = 128
_MIB = 1 << 20


# ----------------------------------------------------------------------------
# Helpers
# ----------------------------------------------------------------------------
def _round_up(n, m):
    return ((n + m - 1) // m) * m


def _pad_axis(x, axis, target):
    pad = target - x.shape[axis]
    if pad <= 0:
        return x
    widths = [(0, 0)] * x.ndim
    widths[axis] = (0, pad)
    return jnp.pad(x, widths)


def _nbytes(shape, dtype):
    return math.prod(shape) * jnp.dtype(dtype).itemsize


# ----------------------------------------------------------------------------
# Pallas kernels
# ----------------------------------------------------------------------------
def _tower(x_ref, w1_ref, b1_ref, w2_ref, b2_ref):
    """relu(x @ w1 + b1) @ w2 + b2: bf16 MXU operands, f32 accumulation."""
    h = jnp.dot(x_ref[...], w1_ref[...],
                preferred_element_type=jnp.float32) + b1_ref[...]
    h = jnp.maximum(h, 0.0)                                   # VPU, f32
    y = jnp.dot(h.astype(jnp.bfloat16), w2_ref[...],
                preferred_element_type=jnp.float32) + b2_ref[...]
    return y                                                  # (tb, emb_p) f32


def _two_tower_fused_kernel(q_ref, d_ref,
                            qw1_ref, qb1_ref, qw2_ref, qb2_ref,
                            dw1_ref, db1_ref, dw2_ref, db2_ref,
                            qemb_ref, demb_ref, sim_ref):
    """forward() of both towers + compute_similarity() in one kernel body."""
    q_emb = _tower(q_ref, qw1_ref, qb1_ref, qw2_ref, qb2_ref)
    d_emb = _tower(d_ref, dw1_ref, db1_ref, dw2_ref, db2_ref)
    qemb_ref[...] = q_emb.astype(qemb_ref.dtype)
    demb_ref[...] = d_emb.astype(demb_ref.dtype)
    # sum(q*d, dim=1): elementwise VPU multiply + last-axis XLU reduce.
    # Padded emb lanes are exactly zero, so reducing over emb_p is exact.
    sim_ref[...] = jnp.sum(q_emb * d_emb, axis=1,
                           keepdims=True).astype(sim_ref.dtype)


def _similarity_kernel(q_ref, d_ref, sim_ref):
    """Standalone compute_similarity on precomputed embeddings (batch-tiled)."""
    prod = q_ref[...].astype(jnp.float32) * d_ref[...].astype(jnp.float32)
    sim_ref[...] = jnp.sum(prod, axis=1, keepdims=True).astype(sim_ref.dtype)


# ----------------------------------------------------------------------------
# Wrappers
# ----------------------------------------------------------------------------
def _prep_tower_params(params):
    """Pad hidden/emb dims to 128 lanes; weights -> bf16, biases -> f32.

    The first layer's input (K) dim is left at its logical width: a
    full-extent BlockSpec is legal and Mosaic layout-pads it in VMEM for free.
    (For hidden/emb > 128 on v6e/v7x, padding to 256 would fill the 256x256
    MXU; 128 multiples are native on v5e.)
    """
    w1, b1, w2, b2 = params
    hid_p = _round_up(w1.shape[1], LANE)
    emb_p = _round_up(w2.shape[1], LANE)
    w1p = _pad_axis(w1, 1, hid_p).astype(jnp.bfloat16)
    b1p = _pad_axis(b1, 1, hid_p).astype(jnp.float32)
    w2p = _pad_axis(_pad_axis(w2, 0, hid_p), 1, emb_p).astype(jnp.bfloat16)
    b2p = _pad_axis(b2, 1, emb_p).astype(jnp.float32)
    return w1p, b1p, w2p, b2p


def two_tower_forward_with_similarity(query, document, q_params, d_params, *,
                                      block_b=512, emb_dtype=jnp.float32,
                                      single_buffer_weights=True):
    """Fused forward(): returns (q_emb, d_emb, sim) from one pallas_call."""
    assert query.shape[0] == document.shape[0]
    B = query.shape[0]
    emb = q_params[2].shape[1]
    assert d_params[2].shape[1] == emb, "towers must share embedding dim"

    qw1, qb1, qw2, qb2 = _prep_tower_params(q_params)
    dw1, db1, dw2, db2 = _prep_tower_params(d_params)
    q_in, hid_p = qw1.shape
    d_in = dw1.shape[0]
    emb_p = qw2.shape[1]

    # Activations: one bf16 cast (no feature-dim HBM pad pass).  Batch is
    # padded only when it does not divide into the batch tile.
    b_pad = _round_up(B, 8)
    tb = min(block_b, b_pad)
    b_pad = _round_up(b_pad, tb)
    q_act = _pad_axis(query.astype(jnp.bfloat16), 0, b_pad)
    d_act = _pad_axis(document.astype(jnp.bfloat16), 0, b_pad)

    grid = (b_pad // tb,)
    batch_map = lambda i: (i, 0)     # tile batch, keep features whole
    weight_map = lambda i: (0, 0)    # weights stay VMEM-resident across steps

    weights = (qw1, qb1, qw2, qb2, dw1, db1, dw2, db2)
    weight_bytes = sum(_nbytes(w.shape, w.dtype) for w in weights)
    act_tile_bytes = (_nbytes((tb, q_in), jnp.bfloat16)
                      + _nbytes((tb, d_in), jnp.bfloat16))
    out_tile_bytes = (2 * _nbytes((tb, emb_p), emb_dtype)
                      + _nbytes((tb, 1), jnp.float32))

    # Advisory cost for XLA's scheduler.
    flops = 2 * b_pad * ((q_in + d_in) * hid_p + 2 * hid_p * emb_p) + 2 * b_pad * emb_p
    total_bytes = (_nbytes((b_pad, q_in), jnp.bfloat16)
                   + _nbytes((b_pad, d_in), jnp.bfloat16)
                   + weight_bytes
                   + 2 * _nbytes((b_pad, emb_p), emb_dtype)
                   + _nbytes((b_pad, 1), jnp.float32))
    cost = pl.CostEstimate(flops=int(flops), transcendentals=0,
                           bytes_accessed=int(total_bytes))

    # Explicit VMEM budget (single-buffered weights + double-buffered tiles +
    # f32 intermediates), clamped to v7x's 64 MiB physical VMEM.
    weight_buf = 1 if single_buffer_weights else 2
    vmem_needed = (weight_buf * weight_bytes
                   + 2 * act_tile_bytes
                   + 2 * out_tile_bytes
                   + 2 * tb * hid_p * 4
                   + 2 * tb * emb_p * 4)
    vmem_limit = int(min(max(2 * vmem_needed, 32 * _MIB), 64 * _MIB))

    def run(single_buffer):
        wkw = dict(pipeline_mode=pl.Buffered(1)) if single_buffer else {}
        in_specs = [
            pl.BlockSpec((tb, q_in), batch_map),
            pl.BlockSpec((tb, d_in), batch_map),
            pl.BlockSpec((q_in, hid_p), weight_map, **wkw),
            pl.BlockSpec((1, hid_p), weight_map, **wkw),
            pl.BlockSpec((hid_p, emb_p), weight_map, **wkw),
            pl.BlockSpec((1, emb_p), weight_map, **wkw),
            pl.BlockSpec((d_in, hid_p), weight_map, **wkw),
            pl.BlockSpec((1, hid_p), weight_map, **wkw),
            pl.BlockSpec((hid_p, emb_p), weight_map, **wkw),
            pl.BlockSpec((1, emb_p), weight_map, **wkw),
        ]
        return pl.pallas_call(
            _two_tower_fused_kernel,
            out_shape=(
                jax.ShapeDtypeStruct((b_pad, emb_p), emb_dtype),
                jax.ShapeDtypeStruct((b_pad, emb_p), emb_dtype),
                jax.ShapeDtypeStruct((b_pad, 1), jnp.float32),
            ),
            grid=grid,
            in_specs=in_specs,
            out_specs=(
                pl.BlockSpec((tb, emb_p), batch_map),
                pl.BlockSpec((tb, emb_p), batch_map),
                pl.BlockSpec((tb, 1), batch_map),
            ),
            compiler_params=pltpu.CompilerParams(
                dimension_semantics=("parallel",),
                vmem_limit_bytes=vmem_limit,
            ),
            cost_estimate=cost,
        )(q_act, d_act, *weights)

    if single_buffer_weights:
        try:
            q_emb_p, d_emb_p, sim = run(True)
        except Exception:
            # pipeline_mode=pl.Buffered(1) unsupported on this jax -> fall back
            # to default double-buffered weight blocks (correctness unchanged).
            q_emb_p, d_emb_p, sim = run(False)
    else:
        q_emb_p, d_emb_p, sim = run(False)

    return q_emb_p[:B, :emb], d_emb_p[:B, :emb], sim[:B, 0]


def two_tower_forward(query, document, q_params, d_params, **kwargs):
    """TwoTowerModel.forward: (query_embedding, doc_embedding)."""
    q_emb, d_emb, _ = two_tower_forward_with_similarity(
        query, document, q_params, d_params, **kwargs)
    return q_emb, d_emb


def compute_similarity(q_emb, d_emb, *, block_b=512):
    """TwoTowerModel.compute_similarity: sum(q * d, dim=1) -> shape [batch]."""
    assert q_emb.shape == d_emb.shape
    B, E = q_emb.shape
    b_pad = _round_up(B, 8)
    tb = min(block_b, b_pad)
    b_pad = _round_up(b_pad, tb)
    qp = _pad_axis(q_emb, 0, b_pad)
    dp = _pad_axis(d_emb, 0, b_pad)
    sim = pl.pallas_call(
        _similarity_kernel,
        out_shape=jax.ShapeDtypeStruct((b_pad, 1), jnp.float32),
        grid=(b_pad // tb,),
        in_specs=[
            pl.BlockSpec((tb, E), lambda i: (i, 0)),
            pl.BlockSpec((tb, E), lambda i: (i, 0)),
        ],
        out_specs=pl.BlockSpec((tb, 1), lambda i: (i, 0)),
        compiler_params=pltpu.CompilerParams(
            dimension_semantics=("parallel",),
        ),
    )(qp, dp)
    return sim[:B, 0]


# ----------------------------------------------------------------------------
# Deterministic parameter init (synthetic; no checkpoint loading)
# ----------------------------------------------------------------------------
def init_tower_params(key, in_dim, hidden_dim, emb_dim):
    k1, k2, k3, k4 = jax.random.split(key, 4)
    w1 = jax.random.normal(k1, (in_dim, hidden_dim), jnp.float32) * 0.1
    b1 = jax.random.normal(k2, (1, hidden_dim), jnp.float32) * 0.01
    w2 = jax.random.normal(k3, (hidden_dim, emb_dim), jnp.float32) * 0.1
    b2 = jax.random.normal(k4, (1, emb_dim), jnp.float32) * 0.01
    return (w1, b1, w2, b2)


# ----------------------------------------------------------------------------
# Main
# ----------------------------------------------------------------------------
if __name__ == "__main__":
    batch, q_in_dim, d_in_dim, hidden, emb = 8, 32, 48, 64, 32

    key = jax.random.PRNGKey(0)
    k_q_in, k_d_in, k_q_par, k_d_par = jax.random.split(key, 4)

    query = jax.random.normal(k_q_in, (batch, q_in_dim), jnp.float32)
    document = jax.random.normal(k_d_in, (batch, d_in_dim), jnp.float32)

    q_params = init_tower_params(k_q_par, q_in_dim, hidden, emb)
    d_params = init_tower_params(k_d_par, d_in_dim, hidden, emb)

    # Fused forward() + compute_similarity() in a single pallas_call (f32 out).
    q_emb, d_emb, sim_fused = two_tower_forward_with_similarity(
        query, document, q_params, d_params)
    q_emb = jax.block_until_ready(q_emb)
    d_emb = jax.block_until_ready(d_emb)
    sim_fused = jax.block_until_ready(sim_fused)

    # Same call with bf16 embedding writeback (halved HBM write traffic).
    q16, d16, sim16 = two_tower_forward_with_similarity(
        query, document, q_params, d_params, emb_dtype=jnp.bfloat16)
    q16 = jax.block_until_ready(q16)

    # Standalone compute_similarity() on the produced embeddings.
    sim_standalone = jax.block_until_ready(compute_similarity(q_emb, d_emb))

    # --- References ---------------------------------------------------------
    # bf16-operand / f32-accumulation reference (matches kernel numerics).
    def ref_tower_bf16(x, p):
        w1, b1, w2, b2 = p
        h = jnp.dot(x.astype(jnp.bfloat16), w1.astype(jnp.bfloat16),
                    preferred_element_type=jnp.float32) + b1
        h = jnp.maximum(h, 0.0)
        return jnp.dot(h.astype(jnp.bfloat16), w2.astype(jnp.bfloat16),
                       preferred_element_type=jnp.float32) + b2

    # Pure f32 reference (original module semantics) for a loose sanity check.
    def ref_tower_f32(x, p):
        w1, b1, w2, b2 = p
        return jnp.maximum(x @ w1 + b1, 0.0) @ w2 + b2

    q_ref16 = ref_tower_bf16(query, q_params)
    d_ref16 = ref_tower_bf16(document, d_params)
    sim_ref16 = jnp.sum(q_ref16 * d_ref16, axis=1)

    q_ref32 = ref_tower_f32(query, q_params)
    d_ref32 = ref_tower_f32(document, d_params)

    assert q_emb.shape == (batch, emb) and d_emb.shape == (batch, emb)
    assert sim_fused.shape == (batch,) and sim_standalone.shape == (batch,)

    # Tight check against the numerics-matched reference.
    assert jnp.allclose(q_emb, q_ref16, atol=1e-4, rtol=1e-4)
    assert jnp.allclose(d_emb, d_ref16, atol=1e-4, rtol=1e-4)
    assert jnp.allclose(sim_fused, sim_ref16, atol=1e-3, rtol=1e-3)
    # bf16-writeback variant: loose check (cast-of-result error only).
    assert jnp.allclose(q16.astype(jnp.float32), q_ref16, atol=1e-2, rtol=5e-2)
    assert jnp.allclose(sim16, sim_ref16, atol=1e-3, rtol=1e-3)
    # Standalone similarity must match an exact f32 row-dot of the embeddings.
    assert jnp.allclose(sim_standalone, jnp.sum(q_emb * d_emb, axis=1),
                        atol=1e-4, rtol=1e-4)
    # Loose sanity check against the full-f32 module semantics.
    assert jnp.allclose(q_emb, q_ref32, atol=1e-1, rtol=1e-1)
    assert jnp.allclose(d_emb, d_ref32, atol=1e-1, rtol=1e-1)

    print("KERNEL_OK")
</pallas_src>

<mosaic_0001>
module attributes {stable_mosaic.version = 11 : i64} {
  func.func @_two_tower_fused_kernel(%arg0: i32, %arg1: memref<8x32xbf16, #tpu.memory_space<vmem>>, %arg2: memref<8x48xbf16, #tpu.memory_space<vmem>>, %arg3: memref<32x128xbf16, #tpu.memory_space<vmem>>, %arg4: memref<1x128xf32, #tpu.memory_space<vmem>>, %arg5: memref<128x128xbf16, #tpu.memory_space<vmem>>, %arg6: memref<1x128xf32, #tpu.memory_space<vmem>>, %arg7: memref<48x128xbf16, #tpu.memory_space<vmem>>, %arg8: memref<1x128xf32, #tpu.memory_space<vmem>>, %arg9: memref<128x128xbf16, #tpu.memory_space<vmem>>, %arg10: memref<1x128xf32, #tpu.memory_space<vmem>>, %arg11: memref<8x128xf32, #tpu.memory_space<vmem>>, %arg12: memref<8x128xf32, #tpu.memory_space<vmem>>, %arg13: memref<8x1xf32, #tpu.memory_space<vmem>>) attributes {dimension_semantics = [#tpu.dimension_semantics<parallel>], iteration_bounds = array<i64: 1>, scalar_prefetch = 0 : i64, scratch_operands = 0 : i64, tpu.core_type = #tpu.core_type<tc>, window_params = [{transform_indices = @transform_0, window_bounds = array<i64: 8, 32>}, {transform_indices = @transform_1, window_bounds = array<i64: 8, 48>}, {pipeline_mode = #tpu.pipeline_mode<synchronous>, transform_indices = @transform_2, window_bounds = array<i64: 32, 128>}, {pipeline_mode = #tpu.pipeline_mode<synchronous>, transform_indices = @transform_3, window_bounds = array<i64: 1, 128>}, {pipeline_mode = #tpu.pipeline_mode<synchronous>, transform_indices = @transform_4, window_bounds = array<i64: 128, 128>}, {pipeline_mode = #tpu.pipeline_mode<synchronous>, transform_indices = @transform_5, window_bounds = array<i64: 1, 128>}, {pipeline_mode = #tpu.pipeline_mode<synchronous>, transform_indices = @transform_6, window_bounds = array<i64: 48, 128>}, {pipeline_mode = #tpu.pipeline_mode<synchronous>, transform_indices = @transform_7, window_bounds = array<i64: 1, 128>}, {pipeline_mode = #tpu.pipeline_mode<synchronous>, transform_indices = @transform_8, window_bounds = array<i64: 128, 128>}, {pipeline_mode = #tpu.pipeline_mode<synchronous>, transform_indices = @transform_9, window_bounds = array<i64: 1, 128>}, {transform_indices = @transform_10, window_bounds = array<i64: 8, 128>}, {transform_indices = @transform_11, window_bounds = array<i64: 8, 128>}, {transform_indices = @transform_12, window_bounds = array<i64: 8, 1>}]} {
    %c0 = arith.constant 0 : index
    %c0_0 = arith.constant 0 : index
    %0 = vector.load %arg1[%c0, %c0_0] : memref<8x32xbf16, #tpu.memory_space<vmem>>, vector<8x32xbf16>
    %c0_1 = arith.constant 0 : index
    %c0_2 = arith.constant 0 : index
    %1 = vector.load %arg3[%c0_1, %c0_2] : memref<32x128xbf16, #tpu.memory_space<vmem>>, vector<32x128xbf16>
    %cst = arith.constant dense<0.000000e+00> : vector<8x128xf32>
    %2 = tpu.matmul %0, %1, %cst {dimension_numbers = #tpu.dot_dimension_numbers<[1], [0], [0], [1], [0, 0, 1, 1], [], []>} : vector<8x32xbf16>, vector<32x128xbf16>, vector<8x128xf32> -> vector<8x128xf32>
    %c0_3 = arith.constant 0 : index
    %c0_4 = arith.constant 0 : index
    %3 = vector.load %arg4[%c0_3, %c0_4] : memref<1x128xf32, #tpu.memory_space<vmem>>, vector<1x128xf32>
    %4 = vector.broadcast %3 : vector<1x128xf32> to vector<8x128xf32>
    %5 = arith.addf %2, %4 : vector<8x128xf32>
    %cst_5 = arith.constant 0.000000e+00 : f32
    %6 = vector.broadcast %cst_5 : f32 to vector<8x128xf32>
    %7 = arith.maximumf %5, %6 : vector<8x128xf32>
    %8 = arith.truncf %7 : vector<8x128xf32> to vector<8x128xbf16>
    %c0_6 = arith.constant 0 : index
    %c0_7 = arith.constant 0 : index
    %9 = vector.load %arg5[%c0_6, %c0_7] : memref<128x128xbf16, #tpu.memory_space<vmem>>, vector<128x128xbf16>
    %cst_8 = arith.constant dense<0.000000e+00> : vector<8x128xf32>
    %10 = tpu.matmul %8, %9, %cst_8 {dimension_numbers = #tpu.dot_dimension_numbers<[1], [0], [0], [1], [0, 0, 1, 1], [], []>} : vector<8x128xbf16>, vector<128x128xbf16>, vector<8x128xf32> -> vector<8x128xf32>
    %c0_9 = arith.constant 0 : index
    %c0_10 = arith.constant 0 : index
    %11 = vector.load %arg6[%c0_9, %c0_10] : memref<1x128xf32, #tpu.memory_space<vmem>>, vector<1x128xf32>
    %12 = vector.broadcast %11 : vector<1x128xf32> to vector<8x128xf32>
    %13 = arith.addf %10, %12 : vector<8x128xf32>
    %c0_11 = arith.constant 0 : index
    %c0_12 = arith.constant 0 : index
    %14 = vector.load %arg2[%c0_11, %c0_12] : memref<8x48xbf16, #tpu.memory_space<vmem>>, vector<8x48xbf16>
    %c0_13 = arith.constant 0 : index
    %c0_14 = arith.constant 0 : index
    %15 = vector.load %arg7[%c0_13, %c0_14] : memref<48x128xbf16, #tpu.memory_space<vmem>>, vector<48x128xbf16>
    %cst_15 = arith.constant dense<0.000000e+00> : vector<8x128xf32>
    %16 = tpu.matmul %14, %15, %cst_15 {dimension_numbers = #tpu.dot_dimension_numbers<[1], [0], [0], [1], [0, 0, 1, 1], [], []>} : vector<8x48xbf16>, vector<48x128xbf16>, vector<8x128xf32> -> vector<8x128xf32>
    %c0_16 = arith.constant 0 : index
    %c0_17 = arith.constant 0 : index
    %17 = vector.load %arg8[%c0_16, %c0_17] : memref<1x128xf32, #tpu.memory_space<vmem>>, vector<1x128xf32>
    %18 = vector.broadcast %17 : vector<1x128xf32> to vector<8x128xf32>
    %19 = arith.addf %16, %18 : vector<8x128xf32>
    %cst_18 = arith.constant 0.000000e+00 : f32
    %20 = vector.broadcast %cst_18 : f32 to vector<8x128xf32>
    %21 = arith.maximumf %19, %20 : vector<8x128xf32>
    %22 = arith.truncf %21 : vector<8x128xf32> to vector<8x128xbf16>
    %c0_19 = arith.constant 0 : index
    %c0_20 = arith.constant 0 : index
    %23 = vector.load %arg9[%c0_19, %c0_20] : memref<128x128xbf16, #tpu.memory_space<vmem>>, vector<128x128xbf16>
    %cst_21 = arith.constant dense<0.000000e+00> : vector<8x128xf32>
    %24 = tpu.matmul %22, %23, %cst_21 {dimension_numbers = #tpu.dot_dimension_numbers<[1], [0], [0], [1], [0, 0, 1, 1], [], []>} : vector<8x128xbf16>, vector<128x128xbf16>, vector<8x128xf32> -> vector<8x128xf32>
    %c0_22 = arith.constant 0 : index
    %c0_23 = arith.constant 0 : index
    %25 = vector.load %arg10[%c0_22, %c0_23] : memref<1x128xf32, #tpu.memory_space<vmem>>, vector<1x128xf32>
    %26 = vector.broadcast %25 : vector<1x128xf32> to vector<8x128xf32>
    %27 = arith.addf %24, %26 : vector<8x128xf32>
    %c0_24 = arith.constant 0 : index
    %c0_25 = arith.constant 0 : index
    %28 = vector.load %arg11[%c0_24, %c0_25] : memref<8x128xf32, #tpu.memory_space<vmem>>, vector<8x128xf32>
    tpu.vector_store %arg11[%c0_24, %c0_25], %13 {strides = array<i32>} : memref<8x128xf32, #tpu.memory_space<vmem>>, vector<8x128xf32>,
    %c0_26 = arith.constant 0 : index
    %c0_27 = arith.constant 0 : index
    %29 = vector.load %arg12[%c0_26, %c0_27] : memref<8x128xf32, #tpu.memory_space<vmem>>, vector<8x128xf32>
    tpu.vector_store %arg12[%c0_26, %c0_27], %27 {strides = array<i32>} : memref<8x128xf32, #tpu.memory_space<vmem>>, vector<8x128xf32>,
    %30 = arith.mulf %13, %27 : vector<8x128xf32>
    %cst_28 = arith.constant dense<0.000000e+00> : vector<8xf32>
    %31 = vector.multi_reduction <add>, %30, %cst_28 [1] : vector<8x128xf32> to vector<8xf32>
    %32 = vector.shape_cast %31 : vector<8xf32> to vector<8x1xf32>
    %c0_29 = arith.constant 0 : index
    %c0_30 = arith.constant 0 : index
    %33 = vector.load %arg13[%c0_29, %c0_30] : memref<8x1xf32, #tpu.memory_space<vmem>>, vector<8x1xf32>
    tpu.vector_store %arg13[%c0_29, %c0_30], %32 {strides = array<i32>} : memref<8x1xf32, #tpu.memory_space<vmem>>, vector<8x1xf32>,
    return
  }
  func.func @transform_0(%arg0: i32) -> (i32, i32) {
    %c0_i32 = arith.constant 0 : i32
    %c0_i32_0 = arith.constant 0 : i32
    return %arg0, %c0_i32 : i32, i32
  }
  func.func @transform_1(%arg0: i32) -> (i32, i32) {
    %c0_i32 = arith.constant 0 : i32
    %c0_i32_0 = arith.constant 0 : i32
    return %arg0, %c0_i32 : i32, i32
  }
  func.func @transform_2(%arg0: i32) -> (i32, i32) {
    %c0_i32 = arith.constant 0 : i32
    %c0_i32_0 = arith.constant 0 : i32
    %c0_i32_1 = arith.constant 0 : i32
    return %c0_i32, %c0_i32_0 : i32, i32
  }
  func.func @transform_3(%arg0: i32) -> (i32, i32) {
    %c0_i32 = arith.constant 0 : i32
    %c0_i32_0 = arith.constant 0 : i32
    %c0_i32_1 = arith.constant 0 : i32
    return %c0_i32, %c0_i32_0 : i32, i32
  }
  func.func @transform_4(%arg0: i32) -> (i32, i32) {
    %c0_i32 = arith.constant 0 : i32
    %c0_i32_0 = arith.constant 0 : i32
    %c0_i32_1 = arith.constant 0 : i32
    return %c0_i32, %c0_i32_0 : i32, i32
  }
  func.func @transform_5(%arg0: i32) -> (i32, i32) {
    %c0_i32 = arith.constant 0 : i32
    %c0_i32_0 = arith.constant 0 : i32
    %c0_i32_1 = arith.constant 0 : i32
    return %c0_i32, %c0_i32_0 : i32, i32
  }
  func.func @transform_6(%arg0: i32) -> (i32, i32) {
    %c0_i32 = arith.constant 0 : i32
    %c0_i32_0 = arith.constant 0 : i32
    %c0_i32_1 = arith.constant 0 : i32
    return %c0_i32, %c0_i32_0 : i32, i32
  }
  func.func @transform_7(%arg0: i32) -> (i32, i32) {
    %c0_i32 = arith.constant 0 : i32
    %c0_i32_0 = arith.constant 0 : i32
    %c0_i32_1 = arith.constant 0 : i32
    return %c0_i32, %c0_i32_0 : i32, i32
  }
  func.func @transform_8(%arg0: i32) -> (i32, i32) {
    %c0_i32 = arith.constant 0 : i32
    %c0_i32_0 = arith.constant 0 : i32
    %c0_i32_1 = arith.constant 0 : i32
    return %c0_i32, %c0_i32_0 : i32, i32
  }
  func.func @transform_9(%arg0: i32) -> (i32, i32) {
    %c0_i32 = arith.constant 0 : i32
    %c0_i32_0 = arith.constant 0 : i32
    %c0_i32_1 = arith.constant 0 : i32
    return %c0_i32, %c0_i32_0 : i32, i32
  }
  func.func @transform_10(%arg0: i32) -> (i32, i32) {
    %c0_i32 = arith.constant 0 : i32
    %c0_i32_0 = arith.constant 0 : i32
    return %arg0, %c0_i32 : i32, i32
  }
  func.func @transform_11(%arg0: i32) -> (i32, i32) {
    %c0_i32 = arith.constant 0 : i32
    %c0_i32_0 = arith.constant 0 : i32
    return %arg0, %c0_i32 : i32, i32
  }
  func.func @transform_12(%arg0: i32) -> (i32, i32) {
    %c0_i32 = arith.constant 0 : i32
    %c0_i32_0 = arith.constant 0 : i32
    return %arg0, %c0_i32 : i32, i32
  }
}

module attributes {stable_mosaic.version = 11 : i64} {
  func.func @_two_tower_fused_kernel(%arg0: i32, %arg1: memref<8x32xbf16, #tpu.memory_space<vmem>>, %arg2: memref<8x48xbf16, #tpu.memory_space<vmem>>, %arg3: memref<32x128xbf16, #tpu.memory_space<vmem>>, %arg4: memref<1x128xf32, #tpu.memory_space<vmem>>, %arg5: memref<128x128xbf16, #tpu.memory_space<vmem>>, %arg6: memref<1x128xf32, #tpu.memory_space<vmem>>, %arg7: memref<48x128xbf16, #tpu.memory_space<vmem>>, %arg8: memref<1x128xf32, #tpu.memory_space<vmem>>, %arg9: memref<128x128xbf16, #tpu.memory_space<vmem>>, %arg10: memref<1x128xf32, #tpu.memory_space<vmem>>, %arg11: memref<8x128xf32, #tpu.memory_space<vmem>>, %arg12: memref<8x128xf32, #tpu.memory_space<vmem>>, %arg13: memref<8x1xf32, #tpu.memory_space<vmem>>) attributes {dimension_semantics = [#tpu.dimension_semantics<parallel>], iteration_bounds = array<i64: 1>, scalar_prefetch = 0 : i64, scratch_operands = 0 : i64, tpu.core_type = #tpu.core_type<tc>, window_params = [{transform_indices = @transform_0, window_bounds = array<i64: 8, 32>}, {transform_indices = @transform_1, window_bounds = array<i64: 8, 48>}, {pipeline_mode = #tpu.pipeline_mode<synchronous>, transform_indices = @transform_2, window_bounds = array<i64: 32, 128>}, {pipeline_mode = #tpu.pipeline_mode<synchronous>, transform_indices = @transform_3, window_bounds = array<i64: 1, 128>}, {pipeline_mode = #tpu.pipeline_mode<synchronous>, transform_indices = @transform_4, window_bounds = array<i64: 128, 128>}, {pipeline_mode = #tpu.pipeline_mode<synchronous>, transform_indices = @transform_5, window_bounds = array<i64: 1, 128>}, {pipeline_mode = #tpu.pipeline_mode<synchronous>, transform_indices = @transform_6, window_bounds = array<i64: 48, 128>}, {pipeline_mode = #tpu.pipeline_mode<synchronous>, transform_indices = @transform_7, window_bounds = array<i64: 1, 128>}, {pipeline_mode = #tpu.pipeline_mode<synchronous>, transform_indices = @transform_8, window_bounds = array<i64: 128, 128>}, {pipeline_mode = #tpu.pipeline_mode<synchronous>, transform_indices = @transform_9, window_bounds = array<i64: 1, 128>}, {transform_indices = @transform_10, window_bounds = array<i64: 8, 128>}, {transform_indices = @transform_11, window_bounds = array<i64: 8, 128>}, {transform_indices = @transform_12, window_bounds = array<i64: 8, 1>}]} {
    %c0 = arith.constant 0 : index
    %c0_0 = arith.constant 0 : index
    %0 = vector.load %arg1[%c0, %c0_0] : memref<8x32xbf16, #tpu.memory_space<vmem>>, vector<8x32xbf16>
    %c0_1 = arith.constant 0 : index
    %c0_2 = arith.constant 0 : index
    %1 = vector.load %arg3[%c0_1, %c0_2] : memref<32x128xbf16, #tpu.memory_space<vmem>>, vector<32x128xbf16>
    %cst = arith.constant dense<0.000000e+00> : vector<8x128xf32>
    %2 = tpu.matmul %0, %1, %cst {dimension_numbers = #tpu.dot_dimension_numbers<[1], [0], [0], [1], [0, 0, 1, 1], [], []>} : vector<8x32xbf16>, vector<32x128xbf16>, vector<8x128xf32> -> vector<8x128xf32>
    %c0_3 = arith.constant 0 : index
    %c0_4 = arith.constant 0 : index
    %3 = vector.load %arg4[%c0_3, %c0_4] : memref<1x128xf32, #tpu.memory_space<vmem>>, vector<1x128xf32>
    %4 = vector.broadcast %3 : vector<1x128xf32> to vector<8x128xf32>
    %5 = arith.addf %2, %4 : vector<8x128xf32>
    %cst_5 = arith.constant 0.000000e+00 : f32
    %6 = vector.broadcast %cst_5 : f32 to vector<8x128xf32>
    %7 = arith.maximumf %5, %6 : vector<8x128xf32>
    %8 = arith.truncf %7 : vector<8x128xf32> to vector<8x128xbf16>
    %c0_6 = arith.constant 0 : index
    %c0_7 = arith.constant 0 : index
    %9 = vector.load %arg5[%c0_6, %c0_7] : memref<128x128xbf16, #tpu.memory_space<vmem>>, vector<128x128xbf16>
    %cst_8 = arith.constant dense<0.000000e+00> : vector<8x128xf32>
    %10 = tpu.matmul %8, %9, %cst_8 {dimension_numbers = #tpu.dot_dimension_numbers<[1], [0], [0], [1], [0, 0, 1, 1], [], []>} : vector<8x128xbf16>, vector<128x128xbf16>, vector<8x128xf32> -> vector<8x128xf32>
    %c0_9 = arith.constant 0 : index
    %c0_10 = arith.constant 0 : index
    %11 = vector.load %arg6[%c0_9, %c0_10] : memref<1x128xf32, #tpu.memory_space<vmem>>, vector<1x128xf32>
    %12 = vector.broadcast %11 : vector<1x128xf32> to vector<8x128xf32>
    %13 = arith.addf %10, %12 : vector<8x128xf32>
    %c0_11 = arith.constant 0 : index
    %c0_12 = arith.constant 0 : index
    %14 = vector.load %arg2[%c0_11, %c0_12] : memref<8x48xbf16, #tpu.memory_space<vmem>>, vector<8x48xbf16>
    %c0_13 = arith.constant 0 : index
    %c0_14 = arith.constant 0 : index
    %15 = vector.load %arg7[%c0_13, %c0_14] : memref<48x128xbf16, #tpu.memory_space<vmem>>, vector<48x128xbf16>
    %cst_15 = arith.constant dense<0.000000e+00> : vector<8x128xf32>
    %16 = tpu.matmul %14, %15, %cst_15 {dimension_numbers = #tpu.dot_dimension_numbers<[1], [0], [0], [1], [0, 0, 1, 1], [], []>} : vector<8x48xbf16>, vector<48x128xbf16>, vector<8x128xf32> -> vector<8x128xf32>
    %c0_16 = arith.constant 0 : index
    %c0_17 = arith.constant 0 : index
    %17 = vector.load %arg8[%c0_16, %c0_17] : memref<1x128xf32, #tpu.memory_space<vmem>>, vector<1x128xf32>
    %18 = vector.broadcast %17 : vector<1x128xf32> to vector<8x128xf32>
    %19 = arith.addf %16, %18 : vector<8x128xf32>
    %cst_18 = arith.constant 0.000000e+00 : f32
    %20 = vector.broadcast %cst_18 : f32 to vector<8x128xf32>
    %21 = arith.maximumf %19, %20 : vector<8x128xf32>
    %22 = arith.truncf %21 : vector<8x128xf32> to vector<8x128xbf16>
    %c0_19 = arith.constant 0 : index
    %c0_20 = arith.constant 0 : index
    %23 = vector.load %arg9[%c0_19, %c0_20] : memref<128x128xbf16, #tpu.memory_space<vmem>>, vector<128x128xbf16>
    %cst_21 = arith.constant dense<0.000000e+00> : vector<8x128xf32>
    %24 = tpu.matmul %22, %23, %cst_21 {dimension_numbers = #tpu.dot_dimension_numbers<[1], [0], [0], [1], [0, 0, 1, 1], [], []>} : vector<8x128xbf16>, vector<128x128xbf16>, vector<8x128xf32> -> vector<8x128xf32>
    %c0_22 = arith.constant 0 : index
    %c0_23 = arith.constant 0 : index
    %25 = vector.load %arg10[%c0_22, %c0_23] : memref<1x128xf32, #tpu.memory_space<vmem>>, vector<1x128xf32>
    %26 = vector.broadcast %25 : vector<1x128xf32> to vector<8x128xf32>
    %27 = arith.addf %24, %26 : vector<8x128xf32>
    %c0_24 = arith.constant 0 : index
    %c0_25 = arith.constant 0 : index
    %28 = vector.load %arg11[%c0_24, %c0_25] : memref<8x128xf32, #tpu.memory_space<vmem>>, vector<8x128xf32>
    tpu.vector_store %arg11[%c0_24, %c0_25], %13 {strides = array<i32>} : memref<8x128xf32, #tpu.memory_space<vmem>>, vector<8x128xf32>,
    %c0_26 = arith.constant 0 : index
    %c0_27 = arith.constant 0 : index
    %29 = vector.load %arg12[%c0_26, %c0_27] : memref<8x128xf32, #tpu.memory_space<vmem>>, vector<8x128xf32>
    tpu.vector_store %arg12[%c0_26, %c0_27], %27 {strides = array<i32>} : memref<8x128xf32, #tpu.memory_space<vmem>>, vector<8x128xf32>,
    %30 = arith.mulf %13, %27 : vector<8x128xf32>
    %cst_28 = arith.constant dense<0.000000e+00> : vector<8xf32>
    %31 = vector.multi_reduction <add>, %30, %cst_28 [1] : vector<8x128xf32> to vector<8xf32>
    %32 = vector.shape_cast %31 : vector<8xf32> to vector<8x1xf32>
    %c0_29 = arith.constant 0 : index
    %c0_30 = arith.constant 0 : index
    %33 = vector.load %arg13[%c0_29, %c0_30] : memref<8x1xf32, #tpu.memory_space<vmem>>, vector<8x1xf32>
    tpu.vector_store %arg13[%c0_29, %c0_30], %32 {strides = array<i32>} : memref<8x1xf32, #tpu.memory_space<vmem>>, vector<8x1xf32>,
    return
  }
  func.func @transform_0(%arg0: i32) -> (i32, i32) {
    %c0_i32 = arith.constant 0 : i32
    %c0_i32_0 = arith.constant 0 : i32
    return %arg0, %c0_i32 : i32, i32
  }
  func.func @transform_1(%arg0: i32) -> (i32, i32) {
    %c0_i32 = arith.constant 0 : i32
    %c0_i32_0 = arith.constant 0 : i32
    return %arg0, %c0_i32 : i32, i32
  }
  func.func @transform_2(%arg0: i32) -> (i32, i32) {
    %c0_i32 = arith.constant 0 : i32
    %c0_i32_0 = arith.constant 0 : i32
    %c0_i32_1 = arith.constant 0 : i32
    return %c0_i32, %c0_i32_0 : i32, i32
  }
  func.func @transform_3(%arg0: i32) -> (i32, i32) {
    %c0_i32 = arith.constant 0 : i32
    %c0_i32_0 = arith.constant 0 : i32
    %c0_i32_1 = arith.constant 0 : i32
    return %c0_i32, %c0_i32_0 : i32, i32
  }
  func.func @transform_4(%arg0: i32) -> (i32, i32) {
    %c0_i32 = arith.constant 0 : i32
    %c0_i32_0 = arith.constant 0 : i32
    %c0_i32_1 = arith.constant 0 : i32
    return %c0_i32, %c0_i32_0 : i32, i32
  }
  func.func @transform_5(%arg0: i32) -> (i32, i32) {
    %c0_i32 = arith.constant 0 : i32
    %c0_i32_0 = arith.constant 0 : i32
    %c0_i32_1 = arith.constant 0 : i32
    return %c0_i32, %c0_i32_0 : i32, i32
  }
  func.func @transform_6(%arg0: i32) -> (i32, i32) {
    %c0_i32 = arith.constant 0 : i32
    %c0_i32_0 = arith.constant 0 : i32
    %c0_i32_1 = arith.constant 0 : i32
    return %c0_i32, %c0_i32_0 : i32, i32
  }
  func.func @transform_7(%arg0: i32) -> (i32, i32) {
    %c0_i32 = arith.constant 0 : i32
    %c0_i32_0 = arith.constant 0 : i32
    %c0_i32_1 = arith.constant 0 : i32
    return %c0_i32, %c0_i32_0 : i32, i32
  }
  func.func @transform_8(%arg0: i32) -> (i32, i32) {
    %c0_i32 = arith.constant 0 : i32
    %c0_i32_0 = arith.constant 0 : i32
    %c0_i32_1 = arith.constant 0 : i32
    return %c0_i32, %c0_i32_0 : i32, i32
  }
  func.func @transform_9(%arg0: i32) -> (i32, i32) {
    %c0_i32 = arith.constant 0 : i32
    %c0_i32_0 = arith.constant 0 : i32
    %c0_i32_1 = arith.constant 0 : i32
    return %c0_i32, %c0_i32_0 : i32, i32
  }
  func.func @transform_10(%arg0: i32) -> (i32, i32) {
    %c0_i32 = arith.constant 0 : i32
    %c0_i32_0 = arith.constant 0 : i32
    return %arg0, %c0_i32 : i32, i32
  }
  func.func @transform_11(%arg0: i32) -> (i32, i32) {
    %c0_i32 = arith.constant 0 : i32
    %c0_i32_0 = arith.constant 0 : i32
    return %arg0, %c0_i32 : i32, i32
  }
  func.func @transform_12(%arg0: i32) -> (i32, i32) {
    %c0_i32 = arith.constant 0 : i32
    %c0_i32_0 = arith.constant 0 : i32
    return %arg0, %c0_i32 : i32, i32
  }
}

</mosaic_0001>

<bundles_post_ra>
// kernel: tpu_custom_call.1
= control target key start
LH: loop header
LB: loop body
LE: loop exit
PB: predicated region body
PF: predicated region fallthrough
CT: control target
= control target key end

     0   :  { %18 = vsyncpa [#allocation3], 0  ;;  %s867_s0 = inlined_call_operand.hbm [shape: bf16[8,32], index: 0, kind: input, shape index: {}]   ;;  %s868_s1 = inlined_call_operand.hbm [shape: bf16[8,48], index: 1, kind: input, shape index: {}]   ;;  %s869_s2 = inlined_call_operand.hbm [shape: bf16[32,128], index: 2, kind: input, shape index: {}]   ;;  %s870_s3 = inlined_call_operand.vmem [shape: f32[1,128], index: 3, kind: input, shape index: {}]   ;;  %s871_s4 = inlined_call_operand.hbm [shape: bf16[128,128], index: 4, kind: input, shape index: {}]   ;;  %s872_s5 = inlined_call_operand.vmem [shape: f32[1,128], index: 5, kind: input, shape index: {}]   ;;  %s873_s6 = inlined_call_operand.hbm [shape: bf16[48,128], index: 6, kind: input, shape index: {}]   ;;  %s874_s7 = inlined_call_operand.vmem [shape: f32[1,128], index: 7, kind: input, shape index: {}]   ;;  %s875_s8 = inlined_call_operand.hbm [shape: bf16[128,128], index: 8, kind: input, shape index: {}]   ;;  %s876_s9 = inlined_call_operand.vmem [shape: f32[1,128], index: 9, kind: input, shape index: {}]   ;;  %s877_s10 = inlined_call_operand.hbm [shape: f32[8,128], index: 10, kind: output, shape index: {0}]   ;;  %s878_s11 = inlined_call_operand.hbm [shape: f32[8,128], index: 11, kind: output, shape index: {1}]   ;;  %s879_s12 = inlined_call_operand.vmem [shape: f32[8,1], index: 12, kind: output, shape index: {2}]  }
   0x1   :  { %19 = vsyncpa [#allocation6], 0 }
   0x2   :  { %20 = vsyncpa [#allocation9], 0 }
   0x3   :  { %21 = vsyncpa [#allocation12], 0 }
   0x4   :  { %22 = vsyncpa [#allocation4], 0  ;;  %s40_s23 = sshll.u32 %s868_s1, 4  ;;  %s41_s23 = int_to_ptr.hbm [resolvable:$true] %s40_s23 }
   0x5   :  { %23 = vsyncpa [#allocation15], 0  ;;  %s753_s24 = smov [#allocation5]   ;;  %s65_s28 = sshll.u32 %s871_s4, 4  ;;  %s66_s28 = int_to_ptr.hbm [resolvable:$true] %s65_s28 }
   0x6   :  { %s42_s25 = sshll.u32 %s753_s24, 4  ;;  %s754_s29 = smov [#allocation8]   ;;  %s43_s25 = int_to_ptr.vmem [resolvable:$true] %s42_s25 }
   0x7   :  { %45 = dma.hbm_to_vmem [thread:$0]  %s41_s23, 64, %s43_s25, [#allocation6]  }
   0x8   :  { %s67_s30 = sshll.u32 %s754_s29, 4  ;;  %s29_s15 = sshll.u32 %s867_s0, 4  ;;  %s68_s30 = int_to_ptr.vmem [resolvable:$true] %s67_s30  ;;  %s30_s15 = int_to_ptr.hbm [resolvable:$true] %s29_s15 }
   0x9   :  { %s755_s1 = smov 64   ;;  %s756_s16 = smov 4  }
   0xa   :  { %73 = dma.hbm_to_vmem [thread:$0]  %s66_s28, 1024, %s68_s30, [#allocation9], %s755_s1, %s755_s1, %s756_s16  }
   0xb   :  { %s50_s19 = sshll.u32 %s869_s2, 4  ;;  %s757_s20 = smov [#allocation2]   ;;  %s51_s19 = int_to_ptr.hbm [resolvable:$true] %s50_s19 }
   0xc   :  { %s31_s21 = sshll.u32 %s757_s20, 4  ;;  %s758_s4 = smov [#allocation7]   ;;  %s32_s21 = int_to_ptr.vmem [resolvable:$true] %s31_s21 }
   0xd   :  { %34 = dma.hbm_to_vmem [thread:$0]  %s30_s15, 64, %s32_s21, [#allocation3]  }
   0xe   :  { %s52_s22 = sshll.u32 %s758_s4, 4  ;;  %s80_s0 = sshll.u32 %s873_s6, 4  ;;  %s53_s22 = int_to_ptr.vmem [resolvable:$true] %s52_s22  ;;  %s81_s0 = int_to_ptr.hbm [resolvable:$true] %s80_s0 }
   0xf   :  { %58 = dma.hbm_to_vmem [thread:$0]  %s51_s19, 256, %s53_s22, [#allocation6], %s755_s1, %s755_s1, %s756_s16  }
  0x10   :  { %s95_s27 = sshll.u32 %s875_s8, 4  ;;  %s759_s28 = smov [#allocation10]   ;;  %s96_s27 = int_to_ptr.hbm [resolvable:$true] %s95_s27 }
  0x11   :  { %s82_s2 = sshll.u32 %s759_s28, 4  ;;  %s760_s29 = smov [#allocation11]   ;;  %s83_s2 = int_to_ptr.vmem [resolvable:$true] %s82_s2 }
  0x12   :  { %88 = dma.hbm_to_vmem [thread:$0]  %s81_s0, 384, %s83_s2, [#allocation9], %s755_s1, %s755_s1, %s756_s16  }
  0x13   :  { %s97_s30 = sshll.u32 %s760_s29, 4  ;;  %s98_s30 = int_to_ptr.vmem [resolvable:$true] %s97_s30 }
  0x14   :  { %103 = dma.hbm_to_vmem [thread:$0]  %s96_s27, 1024, %s98_s30, [#allocation12], %s755_s1, %s755_s1, %s756_s16  }
  0x15   :  { %741 = dma.done.wait [#allocation3], 64  }
  0x16   :  { %742 = vsyncadd [#allocation3], 4294967232 }
  0x17   :  { %743 = dma.done.wait [#allocation6], 320  }
  0x18   :  { %744 = vsyncadd [#allocation6], 4294966976 }
  0x19   :  { %745 = dma.done.wait [#allocation9], 1408  }
  0x1a   :  { %746 = vsyncadd [#allocation9], 4294965888 }
  0x1b   :  { %747 = dma.done.wait [#allocation12], 1024  }
  0x1c   :  { %748 = vsyncadd [#allocation12], 4294966272  ;;  %v526_v0 = vld [vmem:[#allocation10 + $0x10] sm:$0xff]  ;;  %v515_v1 = vld [vmem:[#allocation7 + $0x8] sm:$0xff]  ;;  %vm152_vm0 = vcmask 261120   ;;  %vm281_vm1 = vcmask 392192  }
  0x1d   :  { %v525_v2 = vld [vmem:[#allocation10 + $0x8] sm:$0xff]  ;;  %290 = vmatpush.bf16.msra.mxu2 %v526_v0  ;;  %162 = vmatpush.bf16.msra.mxu0 %v515_v1  ;;  %v514_v3 = vld [vmem:[#allocation7] sm:$0xff]  ;;  %v523_v4 = vld [vmem:[#allocation8 + $0x38] sm:$0xff]  ;;  %s762_s21 = smov [#allocation14]   ;;  %s406_s23 = sshll.u32 %s878_s11, 4  ;;  %vm386_vm2 = vcmask 7168   ;;  %s407_s23 = int_to_ptr.hbm [resolvable:$true] %s406_s23 }
  0x1e   :  { %v534_v5 = vld [vmem:[#allocation11 + $0x38] sm:$0xff]  ;;  %239 = vmatpush.bf16.msra.mxu1 %v523_v4  ;;  %v533_v7 = vld [vmem:[#allocation11 + $0x30] sm:$0xff]  ;;  %v524_v8 = vld [vmem:[#allocation10] sm:$0xff]  ;;  %s404_s4 = sshll.u32 %s762_s21, 4  ;;  %s405_s4 = int_to_ptr.vmem [resolvable:$true] %s404_s4 }
  0x1f   :  { %368 = vmatpush.bf16.msra.mxu3 %v534_v5  ;;  %v522_v6 = vld [vmem:[#allocation8 + $0x30] sm:$0xff]  ;;  %v131_v9 = vld [vmem:[#allocation2] sm:$0xf]  ;;  %v532_v11 = vld [vmem:[#allocation11 + $0x28] sm:$0xff] }
  0x20   :  { %v521_v10 = vld [vmem:[#allocation8 + $0x28] sm:$0xff]  ;;  %v520_v13 = vld [vmem:[#allocation8 + $0x20] sm:$0xff]  ;;  %v531_v14 = vld [vmem:[#allocation11 + $0x20] sm:$0xff] }
  0x21   :  { %291 = vmatpush.bf16.msra.mxu2 %v525_v2  ;;  %163 = vmatpush.bf16.msra.mxu0 %v514_v3  ;;  %v252_v12 = vld [vmem:[#allocation5] sm:$0xf]  ;;  %v519_v15 = vld [vmem:[#allocation8 + $0x18] sm:$0xff]  ;;  %v530_v16 = vld [vmem:[#allocation11 + $0x18] sm:$0xff] }
  0x22   :  { %240 = vmatpush.bf16.msra.mxu1 %v522_v6  ;;  %v518_v17 = vld [vmem:[#allocation8 + $0x10] sm:$0xff]  ;;  %v529_v18 = vld [vmem:[#allocation11 + $0x10] sm:$0xff]  ;;  %v528_v20 = vld [vmem:[#allocation11 + $0x8] sm:$0xff] }
  0x23   :  { %369 = vmatpush.bf16.msra.mxu3 %v533_v7  ;;  %v517_v19 = vld [vmem:[#allocation8 + $0x8] sm:$0xff]  ;;  %v516_v21 = vld [vmem:[#allocation8] sm:$0xff]  ;;  %v527_v22 = vld [vmem:[#allocation11] sm:$0xff] }
  0x24   :  { %436 = vmatmul.msk.bf16.vlgmr.msra.gmra.mxu0 %vm152_vm0, %v131_v9  ;;  %v545_v23 = vld [vmem:[%s870_s3] ss:$0 sm:$0xff]  ;;  %s761_s3 = smov [#allocation13]  }
  0x25   :  { %292 = vmatpush.bf16.msra.mxu2 %v524_v8  ;;  %v546_v28 = vld [vmem:[%s874_s7] ss:$0 sm:$0xff]  ;;  %s393_s16 = sshll.u32 %s761_s3, 4  ;;  %s395_s7 = sshll.u32 %s877_s10, 4  ;;  %s394_s16 = int_to_ptr.vmem [resolvable:$true] %s393_s16  ;;  %s396_s7 = int_to_ptr.hbm [resolvable:$true] %s395_s7 }
  0x26   :  { %241 = vmatpush.bf16.msra.mxu1 %v521_v10  ;;  %v547_v35 = vld [vmem:[%s872_s5] ss:$0 sm:$0xff] }
  0x27   :  { %370 = vmatpush.bf16.msra.mxu3 %v532_v11  ;;  %v548_v39 = vld [vmem:[%s876_s9] ss:$0 sm:$0xff] }
  0x28   :  { %481 = vmatmul.msk.bf16.vlgmr.msra.gmra.mxu2 %vm281_vm1, %v252_v12 }
  0x2a   :  { %242 = vmatpush.bf16.msra.mxu1 %v520_v13 }
  0x2b   :  { %371 = vmatpush.bf16.msra.mxu3 %v531_v14 }
  0x2e   :  { %243 = vmatpush.bf16.msra.mxu1 %v519_v15 }
  0x2f   :  { %372 = vmatpush.bf16.msra.mxu3 %v530_v16 }
  0x32   :  { %244 = vmatpush.bf16.msra.mxu1 %v518_v17 }
  0x33   :  { %373 = vmatpush.bf16.msra.mxu3 %v529_v18 }
  0x36   :  { %245 = vmatpush.bf16.msra.mxu1 %v517_v19 }
  0x37   :  { %374 = vmatpush.bf16.msra.mxu3 %v528_v20 }
  0x3a   :  { %246 = vmatpush.bf16.msra.mxu1 %v516_v21 }
  0x3b   :  { %375 = vmatpush.bf16.msra.mxu3 %v527_v22 }
  0xa1   :  { %v165_v24 = vpop.f32.mrf.mxu0 }
  0xa2   :  { %v166_v25 = vadd.f32 %v545_v23, %v165_v24 }
  0xa4   :  { %v169_v26 = vmax.f32 %v166_v25, 0.0 }
  0xa6   :  { %v170_v27 = vpack.c.bf16 %v169_v26, %v169_v26 }
  0xa8   :  { %247 = vmatmul.bf16.vlgmr.msra.gmra.mxu1 %v170_v27 }
  0xa9   :  { %v167_v29 = vpop.f32.mrf.mxu0 }
  0xab   :  { %v294_v30 = vpop.f32.mrf.mxu2 }
  0xac   :  { %v295_v31 = vadd.f32 %v546_v28, %v294_v30 }
  0xae   :  { %v298_v32 = vmax.f32 %v295_v31, 0.0 }
  0xb0   :  { %v299_v33 = vpack.c.bf16 %v298_v32, %v298_v32 }
  0xb2   :  { %376 = vmatmul.bf16.vlgmr.msra.gmra.mxu3 %v299_v33 }
  0xb3   :  { %v296_v34 = vpop.f32.mrf.mxu2 }
 0x125   :  { %v248_v36 = vpop.f32.mrf.mxu1 }
 0x126   :  { %v249_v37 = vadd.f32 %v547_v35, %v248_v36 }
 0x128   :  { %381 = vst [vmem:[#allocation13] sm:$0xff] %v249_v37 }
 0x129   :  { %398 = dma.vmem_to_hbm [thread:$0]  %s394_s16, 128, %s396_s7, [#allocation4]  }
 0x12d   :  { %v250_v38 = vpop.f32.mrf.mxu1 }
 0x135   :  { %v377_v40 = vpop.f32.mrf.mxu3 }
 0x136   :  { %v378_v41 = vadd.f32 %v548_v39, %v377_v40 }
 0x138   :  { %382 = vst [vmem:[#allocation14] sm:$0xff] %v378_v41  ;;  %v383_v42 = vmul.f32 %v378_v41, %v249_v37 }
 0x139   :  { %409 = dma.vmem_to_hbm [thread:$0]  %s405_s4, 128, %s407_s23, [#allocation15]  }
 0x13a   :  { %384 = vadd.xlane.f32.xlu0 %v383_v42 }
 0x13d   :  { %v379_v43 = vpop.f32.mrf.mxu3 }
 0x1ad   :  { %v385_v44 = vpop.xlane.xlu0 %384 }
 0x1ae   :  { %387 = vst.msk [vmem:[%s879_s12] sm:$0xff] %vm386_vm2, %v385_v44 }
 0x1af   :  { %749 = dma.done.wait [#allocation4], 128  }
 0x1b0   :  { %750 = vsyncadd [#allocation4], 4294967168 }
 0x1b1   :  { %751 = dma.done.wait [#allocation15], 128  }
 0x1b2   :  { %752 = vsyncadd [#allocation15], 4294967168 }
 0x1b3   :  { %422 = vsyncpa [#allocation3], 1 }
 0x1b4   :  { %423 = vsyncpa [#allocation6], 1 }
 0x1b5   :  { %424 = vsyncpa [#allocation9], 1 }
 0x1b6   :  { %425 = vsyncpa [#allocation12], 1 }
 0x1b7   :  { %426 = vsyncpa [#allocation4], 1 }
 0x1b8   :  { %427 = vsyncpa [#allocation15], 1 }

// kernel: tpu_custom_call.1
= control target key start
LH: loop header
LB: loop body
LE: loop exit
PB: predicated region body
PF: predicated region fallthrough
CT: control target
= control target key end

     0   :  { %18 = vsyncpa [#allocation3], 0  ;;  %s867_s0 = inlined_call_operand.hbm [shape: bf16[8,32], index: 0, kind: input, shape index: {}]   ;;  %s868_s1 = inlined_call_operand.hbm [shape: bf16[8,48], index: 1, kind: input, shape index: {}]   ;;  %s869_s2 = inlined_call_operand.hbm [shape: bf16[32,128], index: 2, kind: input, shape index: {}]   ;;  %s870_s3 = inlined_call_operand.vmem [shape: f32[1,128], index: 3, kind: input, shape index: {}]   ;;  %s871_s4 = inlined_call_operand.hbm [shape: bf16[128,128], index: 4, kind: input, shape index: {}]   ;;  %s872_s5 = inlined_call_operand.vmem [shape: f32[1,128], index: 5, kind: input, shape index: {}]   ;;  %s873_s6 = inlined_call_operand.hbm [shape: bf16[48,128], index: 6, kind: input, shape index: {}]   ;;  %s874_s7 = inlined_call_operand.vmem [shape: f32[1,128], index: 7, kind: input, shape index: {}]   ;;  %s875_s8 = inlined_call_operand.hbm [shape: bf16[128,128], index: 8, kind: input, shape index: {}]   ;;  %s876_s9 = inlined_call_operand.vmem [shape: f32[1,128], index: 9, kind: input, shape index: {}]   ;;  %s877_s10 = inlined_call_operand.hbm [shape: f32[8,128], index: 10, kind: output, shape index: {0}]   ;;  %s878_s11 = inlined_call_operand.hbm [shape: f32[8,128], index: 11, kind: output, shape index: {1}]   ;;  %s879_s12 = inlined_call_operand.vmem [shape: f32[8,1], index: 12, kind: output, shape index: {2}]  }
   0x1   :  { %19 = vsyncpa [#allocation6], 0 }
   0x2   :  { %20 = vsyncpa [#allocation9], 0 }
   0x3   :  { %21 = vsyncpa [#allocation12], 0 }
   0x4   :  { %22 = vsyncpa [#allocation4], 0  ;;  %s40_s23 = sshll.u32 %s868_s1, 4  ;;  %s41_s23 = int_to_ptr.hbm [resolvable:$true] %s40_s23 }
   0x5   :  { %23 = vsyncpa [#allocation15], 0  ;;  %s753_s24 = smov [#allocation5]   ;;  %s65_s28 = sshll.u32 %s871_s4, 4  ;;  %s66_s28 = int_to_ptr.hbm [resolvable:$true] %s65_s28 }
   0x6   :  { %s42_s25 = sshll.u32 %s753_s24, 4  ;;  %s754_s29 = smov [#allocation8]   ;;  %s43_s25 = int_to_ptr.vmem [resolvable:$true] %s42_s25 }
   0x7   :  { %45 = dma.hbm_to_vmem [thread:$0]  %s41_s23, 64, %s43_s25, [#allocation6]  }
   0x8   :  { %s67_s30 = sshll.u32 %s754_s29, 4  ;;  %s29_s15 = sshll.u32 %s867_s0, 4  ;;  %s68_s30 = int_to_ptr.vmem [resolvable:$true] %s67_s30  ;;  %s30_s15 = int_to_ptr.hbm [resolvable:$true] %s29_s15 }
   0x9   :  { %s755_s1 = smov 64   ;;  %s756_s16 = smov 4  }
   0xa   :  { %73 = dma.hbm_to_vmem [thread:$0]  %s66_s28, 1024, %s68_s30, [#allocation9], %s755_s1, %s755_s1, %s756_s16  }
   0xb   :  { %s50_s19 = sshll.u32 %s869_s2, 4  ;;  %s757_s20 = smov [#allocation2]   ;;  %s51_s19 = int_to_ptr.hbm [resolvable:$true] %s50_s19 }
   0xc   :  { %s31_s21 = sshll.u32 %s757_s20, 4  ;;  %s758_s4 = smov [#allocation7]   ;;  %s32_s21 = int_to_ptr.vmem [resolvable:$true] %s31_s21 }
   0xd   :  { %34 = dma.hbm_to_vmem [thread:$0]  %s30_s15, 64, %s32_s21, [#allocation3]  }
   0xe   :  { %s52_s22 = sshll.u32 %s758_s4, 4  ;;  %s80_s0 = sshll.u32 %s873_s6, 4  ;;  %s53_s22 = int_to_ptr.vmem [resolvable:$true] %s52_s22  ;;  %s81_s0 = int_to_ptr.hbm [resolvable:$true] %s80_s0 }
   0xf   :  { %58 = dma.hbm_to_vmem [thread:$0]  %s51_s19, 256, %s53_s22, [#allocation6], %s755_s1, %s755_s1, %s756_s16  }
  0x10   :  { %s95_s27 = sshll.u32 %s875_s8, 4  ;;  %s759_s28 = smov [#allocation10]   ;;  %s96_s27 = int_to_ptr.hbm [resolvable:$true] %s95_s27 }
  0x11   :  { %s82_s2 = sshll.u32 %s759_s28, 4  ;;  %s760_s29 = smov [#allocation11]   ;;  %s83_s2 = int_to_ptr.vmem [resolvable:$true] %s82_s2 }
  0x12   :  { %88 = dma.hbm_to_vmem [thread:$0]  %s81_s0, 384, %s83_s2, [#allocation9], %s755_s1, %s755_s1, %s756_s16  }
  0x13   :  { %s97_s30 = sshll.u32 %s760_s29, 4  ;;  %s98_s30 = int_to_ptr.vmem [resolvable:$true] %s97_s30 }
  0x14   :  { %103 = dma.hbm_to_vmem [thread:$0]  %s96_s27, 1024, %s98_s30, [#allocation12], %s755_s1, %s755_s1, %s756_s16  }
  0x15   :  { %741 = dma.done.wait [#allocation3], 64  }
  0x16   :  { %742 = vsyncadd [#allocation3], 4294967232 }
  0x17   :  { %743 = dma.done.wait [#allocation6], 320  }
  0x18   :  { %744 = vsyncadd [#allocation6], 4294966976 }
  0x19   :  { %745 = dma.done.wait [#allocation9], 1408  }
  0x1a   :  { %746 = vsyncadd [#allocation9], 4294965888 }
  0x1b   :  { %747 = dma.done.wait [#allocation12], 1024  }
  0x1c   :  { %748 = vsyncadd [#allocation12], 4294966272  ;;  %v526_v0 = vld [vmem:[#allocation10 + $0x10] sm:$0xff]  ;;  %v515_v1 = vld [vmem:[#allocation7 + $0x8] sm:$0xff]  ;;  %vm152_vm0 = vcmask 261120   ;;  %vm281_vm1 = vcmask 392192  }
  0x1d   :  { %v525_v2 = vld [vmem:[#allocation10 + $0x8] sm:$0xff]  ;;  %290 = vmatpush.bf16.msra.mxu2 %v526_v0  ;;  %162 = vmatpush.bf16.msra.mxu0 %v515_v1  ;;  %v514_v3 = vld [vmem:[#allocation7] sm:$0xff]  ;;  %v523_v4 = vld [vmem:[#allocation8 + $0x38] sm:$0xff]  ;;  %s762_s21 = smov [#allocation14]   ;;  %s406_s23 = sshll.u32 %s878_s11, 4  ;;  %vm386_vm2 = vcmask 7168   ;;  %s407_s23 = int_to_ptr.hbm [resolvable:$true] %s406_s23 }
  0x1e   :  { %v534_v5 = vld [vmem:[#allocation11 + $0x38] sm:$0xff]  ;;  %239 = vmatpush.bf16.msra.mxu1 %v523_v4  ;;  %v533_v7 = vld [vmem:[#allocation11 + $0x30] sm:$0xff]  ;;  %v524_v8 = vld [vmem:[#allocation10] sm:$0xff]  ;;  %s404_s4 = sshll.u32 %s762_s21, 4  ;;  %s405_s4 = int_to_ptr.vmem [resolvable:$true] %s404_s4 }
  0x1f   :  { %368 = vmatpush.bf16.msra.mxu3 %v534_v5  ;;  %v522_v6 = vld [vmem:[#allocation8 + $0x30] sm:$0xff]  ;;  %v131_v9 = vld [vmem:[#allocation2] sm:$0xf]  ;;  %v532_v11 = vld [vmem:[#allocation11 + $0x28] sm:$0xff] }
  0x20   :  { %v521_v10 = vld [vmem:[#allocation8 + $0x28] sm:$0xff]  ;;  %v520_v13 = vld [vmem:[#allocation8 + $0x20] sm:$0xff]  ;;  %v531_v14 = vld [vmem:[#allocation11 + $0x20] sm:$0xff] }
  0x21   :  { %291 = vmatpush.bf16.msra.mxu2 %v525_v2  ;;  %163 = vmatpush.bf16.msra.mxu0 %v514_v3  ;;  %v252_v12 = vld [vmem:[#allocation5] sm:$0xf]  ;;  %v519_v15 = vld [vmem:[#allocation8 + $0x18] sm:$0xff]  ;;  %v530_v16 = vld [vmem:[#allocation11 + $0x18] sm:$0xff] }
  0x22   :  { %240 = vmatpush.bf16.msra.mxu1 %v522_v6  ;;  %v518_v17 = vld [vmem:[#allocation8 + $0x10] sm:$0xff]  ;;  %v529_v18 = vld [vmem:[#allocation11 + $0x10] sm:$0xff]  ;;  %v528_v20 = vld [vmem:[#allocation11 + $0x8] sm:$0xff] }
  0x23   :  { %369 = vmatpush.bf16.msra.mxu3 %v533_v7  ;;  %v517_v19 = vld [vmem:[#allocation8 + $0x8] sm:$0xff]  ;;  %v516_v21 = vld [vmem:[#allocation8] sm:$0xff]  ;;  %v527_v22 = vld [vmem:[#allocation11] sm:$0xff] }
  0x24   :  { %436 = vmatmul.msk.bf16.vlgmr.msra.gmra.mxu0 %vm152_vm0, %v131_v9  ;;  %v545_v23 = vld [vmem:[%s870_s3] ss:$0 sm:$0xff]  ;;  %s761_s3 = smov [#allocation13]  }
  0x25   :  { %292 = vmatpush.bf16.msra.mxu2 %v524_v8  ;;  %v546_v28 = vld [vmem:[%s874_s7] ss:$0 sm:$0xff]  ;;  %s393_s16 = sshll.u32 %s761_s3, 4  ;;  %s395_s7 = sshll.u32 %s877_s10, 4  ;;  %s394_s16 = int_to_ptr.vmem [resolvable:$true] %s393_s16  ;;  %s396_s7 = int_to_ptr.hbm [resolvable:$true] %s395_s7 }
  0x26   :  { %241 = vmatpush.bf16.msra.mxu1 %v521_v10  ;;  %v547_v35 = vld [vmem:[%s872_s5] ss:$0 sm:$0xff] }
  0x27   :  { %370 = vmatpush.bf16.msra.mxu3 %v532_v11  ;;  %v548_v39 = vld [vmem:[%s876_s9] ss:$0 sm:$0xff] }
  0x28   :  { %481 = vmatmul.msk.bf16.vlgmr.msra.gmra.mxu2 %vm281_vm1, %v252_v12 }
  0x2a   :  { %242 = vmatpush.bf16.msra.mxu1 %v520_v13 }
  0x2b   :  { %371 = vmatpush.bf16.msra.mxu3 %v531_v14 }
  0x2e   :  { %243 = vmatpush.bf16.msra.mxu1 %v519_v15 }
  0x2f   :  { %372 = vmatpush.bf16.msra.mxu3 %v530_v16 }
  0x32   :  { %244 = vmatpush.bf16.msra.mxu1 %v518_v17 }
  0x33   :  { %373 = vmatpush.bf16.msra.mxu3 %v529_v18 }
  0x36   :  { %245 = vmatpush.bf16.msra.mxu1 %v517_v19 }
  0x37   :  { %374 = vmatpush.bf16.msra.mxu3 %v528_v20 }
  0x3a   :  { %246 = vmatpush.bf16.msra.mxu1 %v516_v21 }
  0x3b   :  { %375 = vmatpush.bf16.msra.mxu3 %v527_v22 }
  0xa1   :  { %v165_v24 = vpop.f32.mrf.mxu0 }
  0xa2   :  { %v166_v25 = vadd.f32 %v545_v23, %v165_v24 }
  0xa4   :  { %v169_v26 = vmax.f32 %v166_v25, 0.0 }
  0xa6   :  { %v170_v27 = vpack.c.bf16 %v169_v26, %v169_v26 }
  0xa8   :  { %247 = vmatmul.bf16.vlgmr.msra.gmra.mxu1 %v170_v27 }
  0xa9   :  { %v167_v29 = vpop.f32.mrf.mxu0 }
  0xab   :  { %v294_v30 = vpop.f32.mrf.mxu2 }
  0xac   :  { %v295_v31 = vadd.f32 %v546_v28, %v294_v30 }
  0xae   :  { %v298_v32 = vmax.f32 %v295_v31, 0.0 }
  0xb0   :  { %v299_v33 = vpack.c.bf16 %v298_v32, %v298_v32 }
  0xb2   :  { %376 = vmatmul.bf16.vlgmr.msra.gmra.mxu3 %v299_v33 }
  0xb3   :  { %v296_v34 = vpop.f32.mrf.mxu2 }
 0x125   :  { %v248_v36 = vpop.f32.mrf.mxu1 }
 0x126   :  { %v249_v37 = vadd.f32 %v547_v35, %v248_v36 }
 0x128   :  { %381 = vst [vmem:[#allocation13] sm:$0xff] %v249_v37 }
 0x129   :  { %398 = dma.vmem_to_hbm [thread:$0]  %s394_s16, 128, %s396_s7, [#allocation4]  }
 0x12d   :  { %v250_v38 = vpop.f32.mrf.mxu1 }
 0x135   :  { %v377_v40 = vpop.f32.mrf.mxu3 }
 0x136   :  { %v378_v41 = vadd.f32 %v548_v39, %v377_v40 }
 0x138   :  { %382 = vst [vmem:[#allocation14] sm:$0xff] %v378_v41  ;;  %v383_v42 = vmul.f32 %v378_v41, %v249_v37 }
 0x139   :  { %409 = dma.vmem_to_hbm [thread:$0]  %s405_s4, 128, %s407_s23, [#allocation15]  }
 0x13a   :  { %384 = vadd.xlane.f32.xlu0 %v383_v42 }
 0x13d   :  { %v379_v43 = vpop.f32.mrf.mxu3 }
 0x1ad   :  { %v385_v44 = vpop.xlane.xlu0 %384 }
 0x1ae   :  { %387 = vst.msk [vmem:[%s879_s12] sm:$0xff] %vm386_vm2, %v385_v44 }
 0x1af   :  { %749 = dma.done.wait [#allocation4], 128  }
 0x1b0   :  { %750 = vsyncadd [#allocation4], 4294967168 }
 0x1b1   :  { %751 = dma.done.wait [#allocation15], 128  }
 0x1b2   :  { %752 = vsyncadd [#allocation15], 4294967168 }
 0x1b3   :  { %422 = vsyncpa [#allocation3], 1 }
 0x1b4   :  { %423 = vsyncpa [#allocation6], 1 }
 0x1b5   :  { %424 = vsyncpa [#allocation9], 1 }
 0x1b6   :  { %425 = vsyncpa [#allocation12], 1 }
 0x1b7   :  { %426 = vsyncpa [#allocation4], 1 }
 0x1b8   :  { %427 = vsyncpa [#allocation15], 1 }

</bundles_post_ra>
